<compile_context>
chip_gen: v7x
topology: tpu7x:2x2x1
jax: 0.10.0
libtpu: 0.0.40
codegen_flags: <defaults>
</compile_context>

<pallas_src>
import functools

import jax
import jax.numpy as jnp
import numpy as np
from jax import lax
from jax.experimental import pallas as pl
from jax.experimental.pallas import tpu as pltpu


def _round_up(x, m):
    return (x + m - 1) // m * m


def _stats_kernel(x_ref, sum_ref, sq_ref):
    """Accumulate per-row sum(x) and sum(x*x) across HW chunks (grid axis 1)."""
    j = pl.program_id(1)

    @pl.when(j == 0)
    def _():
        sum_ref[...] = jnp.zeros_like(sum_ref)
        sq_ref[...] = jnp.zeros_like(sq_ref)

    x = x_ref[...].astype(jnp.float32)
    sum_ref[...] += jnp.sum(x, axis=-1, keepdims=True)
    sq_ref[...] += jnp.sum(x * x, axis=-1, keepdims=True)


def _normalize_kernel(x_ref, scale_ref, shift_ref, o_ref):
    """y = x * scale + shift with per-row folded scale/shift (one FMA/elem)."""
    x = x_ref[...].astype(jnp.float32)
    o_ref[...] = (x * scale_ref[...] + shift_ref[...]).astype(o_ref.dtype)


def switch_norm_2d(x, weight, bias, mean_weight, var_weight,
                   running_mean, running_var, *,
                   eps=1e-5, momentum=0.997,
                   row_tile_max=256, hw_tile_max=2048):
    """SwitchNorm2d forward (training mode, using_bn=True, moving average)."""
    N, C, H, W = x.shape
    hw = H * W
    rows = N * C

    x2 = x.reshape(rows, hw)

    # Tile sizes: sublane tile multiple of 8, lane tile multiple of 128.
    row_tile = min(row_tile_max, _round_up(rows, 8))
    hw_tile = min(hw_tile_max, _round_up(hw, 128))
    rows_p = _round_up(rows, row_tile)
    hw_p = _round_up(hw, hw_tile)

    if (rows_p, hw_p) != (rows, hw):
        # Zero padding is harmless for sum / sum-of-squares accumulation.
        x2p = jnp.pad(x2, ((0, rows_p - rows), (0, hw_p - hw)))
    else:
        x2p = x2

    grid = (rows_p // row_tile, hw_p // hw_tile)
    vmem_limit = 32 * 1024 * 1024  # fits v7x scoped VMEM; tiles are a few MiB

    # ---- Pass 1: streaming per-(n,c) sum / sum-of-squares ------------------
    sums, sqs = pl.pallas_call(
        _stats_kernel,
        grid=grid,
        in_specs=[pl.BlockSpec((row_tile, hw_tile), lambda i, j: (i, j))],
        out_specs=(pl.BlockSpec((row_tile, 1), lambda i, j: (i, 0)),
                   pl.BlockSpec((row_tile, 1), lambda i, j: (i, 0))),
        out_shape=(jax.ShapeDtypeStruct((rows_p, 1), jnp.float32),
                   jax.ShapeDtypeStruct((rows_p, 1), jnp.float32)),
        compiler_params=pltpu.CompilerParams(
            dimension_semantics=("parallel", "arbitrary"),
            vmem_limit_bytes=vmem_limit),
    )(x2p)

    # ---- Tiny mixing math on the (N, C) stats (plain JAX; negligible) ------
    s = sums[:rows, 0].reshape(N, C)
    sq = sqs[:rows, 0].reshape(N, C)
    hw_f = jnp.float32(hw)

    mean_in = s / hw_f                                       # (N, C)
    # torch.Tensor.var default is unbiased (divide by hw - 1); hw == 1 gives
    # the same inf/nan behavior as PyTorch.
    var_in = (sq - hw_f * mean_in * mean_in) / (hw - 1)

    mean_ln = jnp.mean(mean_in, axis=1, keepdims=True)       # (N, 1)
    temp = var_in + mean_in * mean_in
    var_ln = jnp.mean(temp, axis=1, keepdims=True) - mean_ln * mean_ln
    mean_bn = jnp.mean(mean_in, axis=0, keepdims=True)       # (1, C)
    var_bn = jnp.mean(temp, axis=0, keepdims=True) - mean_bn * mean_bn

    mw = jax.nn.softmax(mean_weight.astype(jnp.float32))
    vw = jax.nn.softmax(var_weight.astype(jnp.float32))

    mean = mw[0] * mean_in + mw[1] * mean_ln + mw[2] * mean_bn   # (N, C)
    var = vw[0] * var_in + vw[1] * var_ln + vw[2] * var_bn       # (N, C)

    gamma = weight.reshape(1, C).astype(jnp.float32)
    beta = bias.reshape(1, C).astype(jnp.float32)

    # Fold normalization: y = gamma*(x-mean)*rsqrt(var+eps)+beta = x*scale+shift
    inv = lax.rsqrt(jnp.maximum(var, 0.0) + eps)             # clamp fp-error negatives
    scale = (gamma * inv).reshape(rows, 1)
    shift = (beta - gamma * mean * inv).reshape(rows, 1)

    if rows_p != rows:
        scale = jnp.pad(scale, ((0, rows_p - rows), (0, 0)))
        shift = jnp.pad(shift, ((0, rows_p - rows), (0, 0)))

    # ---- Pass 2: streaming normalize (one load, one FMA, one store) --------
    y2p = pl.pallas_call(
        _normalize_kernel,
        grid=grid,
        in_specs=[pl.BlockSpec((row_tile, hw_tile), lambda i, j: (i, j)),
                  pl.BlockSpec((row_tile, 1), lambda i, j: (i, 0)),
                  pl.BlockSpec((row_tile, 1), lambda i, j: (i, 0))],
        out_specs=pl.BlockSpec((row_tile, hw_tile), lambda i, j: (i, j)),
        out_shape=jax.ShapeDtypeStruct((rows_p, hw_p), x.dtype),
        compiler_params=pltpu.CompilerParams(
            dimension_semantics=("parallel", "parallel"),
            vmem_limit_bytes=vmem_limit),
    )(x2p, scale, shift)

    y = y2p[:rows, :hw].reshape(N, C, H, W)

    # Running-stat update from the kernel-produced BN stats (x is NOT re-read).
    mean_bn3 = mean_bn.reshape(1, C, 1)
    var_bn3 = var_bn.reshape(1, C, 1)
    new_running_mean = momentum * running_mean + (1.0 - momentum) * mean_bn3
    new_running_var = momentum * running_var + (1.0 - momentum) * var_bn3

    return y, new_running_mean, new_running_var


def _reference_forward(x, weight, bias, mean_weight, var_weight, eps=1e-5):
    """Pure-JAX transcription of the PyTorch forward (training mode)."""
    N, C, H, W = x.shape
    xr = x.reshape(N, C, -1)
    mean_in = xr.mean(-1, keepdims=True)
    var_in = jnp.var(xr, axis=-1, keepdims=True, ddof=1)
    mean_ln = mean_in.mean(1, keepdims=True)
    temp = var_in + mean_in ** 2
    var_ln = temp.mean(1, keepdims=True) - mean_ln ** 2
    mean_bn = mean_in.mean(0, keepdims=True)
    var_bn = temp.mean(0, keepdims=True) - mean_bn ** 2
    mw = jax.nn.softmax(mean_weight)
    vw = jax.nn.softmax(var_weight)
    mean = mw[0] * mean_in + mw[1] * mean_ln + mw[2] * mean_bn
    var = vw[0] * var_in + vw[1] * var_ln + vw[2] * var_bn
    xn = (xr - mean) / jnp.sqrt(var + eps)
    xn = xn.reshape(N, C, H, W)
    y = xn * weight.reshape(1, C, 1, 1) + bias.reshape(1, C, 1, 1)
    return y, mean_bn, var_bn


if __name__ == "__main__":
    key = jax.random.PRNGKey(0)
    N, C, H, W = 2, 4, 16, 16

    x = jax.random.normal(key, (N, C, H, W), dtype=jnp.float32)

    # Deterministic parameter init matching SwitchNorm2d.__init__ /
    # reset_parameters (last_gamma=False, using_bn=True).
    weight = jnp.ones((1, C, 1, 1), dtype=jnp.float32)
    bias = jnp.zeros((1, C, 1, 1), dtype=jnp.float32)
    mean_weight = jnp.ones((3,), dtype=jnp.float32)
    var_weight = jnp.ones((3,), dtype=jnp.float32)
    running_mean = jnp.zeros((1, C, 1), dtype=jnp.float32)
    running_var = jnp.zeros((1, C, 1), dtype=jnp.float32)

    momentum = 0.997
    y, new_rm, new_rv = switch_norm_2d(
        x, weight, bias, mean_weight, var_weight, running_mean, running_var,
        eps=1e-5, momentum=momentum)
    jax.block_until_ready((y, new_rm, new_rv))

    y_ref, mean_bn_ref, var_bn_ref = _reference_forward(
        x, weight, bias, mean_weight, var_weight, eps=1e-5)
    np.testing.assert_allclose(np.asarray(y), np.asarray(y_ref),
                               rtol=1e-5, atol=1e-5)

    rm_ref = momentum * running_mean + (1 - momentum) * mean_bn_ref
    rv_ref = momentum * running_var + (1 - momentum) * var_bn_ref
    np.testing.assert_allclose(np.asarray(new_rm), np.asarray(rm_ref),
                               rtol=1e-5, atol=1e-6)
    np.testing.assert_allclose(np.asarray(new_rv), np.asarray(rv_ref),
                               rtol=1e-5, atol=1e-6)

    print("KERNEL_OK")
</pallas_src>

<mosaic_0001>
module attributes {stable_mosaic.version = 11 : i64} {
  func.func @_stats_kernel(%arg0: i32, %arg1: i32, %arg2: memref<8x256xf32, #tpu.memory_space<vmem>>, %arg3: memref<8x1xf32, #tpu.memory_space<vmem>>, %arg4: memref<8x1xf32, #tpu.memory_space<vmem>>) attributes {dimension_semantics = [#tpu.dimension_semantics<parallel>, #tpu.dimension_semantics<arbitrary>], iteration_bounds = array<i64: 1, 1>, scalar_prefetch = 0 : i64, scratch_operands = 0 : i64, tpu.core_type = #tpu.core_type<tc>, window_params = [{transform_indices = @transform_0, window_bounds = array<i64: 8, 256>}, {transform_indices = @transform_1, window_bounds = array<i64: 8, 1>}, {transform_indices = @transform_2, window_bounds = array<i64: 8, 1>}]} {
    %c0_i32 = arith.constant 0 : i32
    %0 = arith.cmpi eq, %arg1, %c0_i32 : i32
    %1 = arith.extui %0 : i1 to i32
    %c0_i32_0 = arith.constant 0 : i32
    %2 = arith.cmpi ne, %1, %c0_i32_0 : i32
    scf.if %2 {
      %cst_11 = arith.constant 0.000000e+00 : f32
      %15 = vector.broadcast %cst_11 : f32 to vector<8x1xf32>
      %c0_12 = arith.constant 0 : index
      %c0_13 = arith.constant 0 : index
      %16 = vector.load %arg3[%c0_12, %c0_13] : memref<8x1xf32, #tpu.memory_space<vmem>>, vector<8x1xf32>
      tpu.vector_store %arg3[%c0_12, %c0_13], %15 {strides = array<i32>} : memref<8x1xf32, #tpu.memory_space<vmem>>, vector<8x1xf32>,
      %cst_14 = arith.constant 0.000000e+00 : f32
      %17 = vector.broadcast %cst_14 : f32 to vector<8x1xf32>
      %c0_15 = arith.constant 0 : index
      %c0_16 = arith.constant 0 : index
      %18 = vector.load %arg4[%c0_15, %c0_16] : memref<8x1xf32, #tpu.memory_space<vmem>>, vector<8x1xf32>
      tpu.vector_store %arg4[%c0_15, %c0_16], %17 {strides = array<i32>} : memref<8x1xf32, #tpu.memory_space<vmem>>, vector<8x1xf32>,
    } else {
    }
    %c0 = arith.constant 0 : index
    %c0_1 = arith.constant 0 : index
    %3 = vector.load %arg2[%c0, %c0_1] : memref<8x256xf32, #tpu.memory_space<vmem>>, vector<8x256xf32>
    %c0_2 = arith.constant 0 : index
    %c0_3 = arith.constant 0 : index
    %4 = vector.load %arg3[%c0_2, %c0_3] : memref<8x1xf32, #tpu.memory_space<vmem>>, vector<8x1xf32>
    %cst = arith.constant dense<0.000000e+00> : vector<8xf32>
    %5 = vector.multi_reduction <add>, %3, %cst [1] : vector<8x256xf32> to vector<8xf32>
    %6 = vector.shape_cast %5 : vector<8xf32> to vector<8x1xf32>
    %7 = arith.addf %4, %6 : vector<8x1xf32>
    %c0_4 = arith.constant 0 : index
    %c0_5 = arith.constant 0 : index
    %8 = vector.load %arg3[%c0_4, %c0_5] : memref<8x1xf32, #tpu.memory_space<vmem>>, vector<8x1xf32>
    tpu.vector_store %arg3[%c0_4, %c0_5], %7 {strides = array<i32>} : memref<8x1xf32, #tpu.memory_space<vmem>>, vector<8x1xf32>,
    %c0_6 = arith.constant 0 : index
    %c0_7 = arith.constant 0 : index
    %9 = vector.load %arg4[%c0_6, %c0_7] : memref<8x1xf32, #tpu.memory_space<vmem>>, vector<8x1xf32>
    %10 = arith.mulf %3, %3 : vector<8x256xf32>
    %cst_8 = arith.constant dense<0.000000e+00> : vector<8xf32>
    %11 = vector.multi_reduction <add>, %10, %cst_8 [1] : vector<8x256xf32> to vector<8xf32>
    %12 = vector.shape_cast %11 : vector<8xf32> to vector<8x1xf32>
    %13 = arith.addf %9, %12 : vector<8x1xf32>
    %c0_9 = arith.constant 0 : index
    %c0_10 = arith.constant 0 : index
    %14 = vector.load %arg4[%c0_9, %c0_10] : memref<8x1xf32, #tpu.memory_space<vmem>>, vector<8x1xf32>
    tpu.vector_store %arg4[%c0_9, %c0_10], %13 {strides = array<i32>} : memref<8x1xf32, #tpu.memory_space<vmem>>, vector<8x1xf32>,
    return
  }
  func.func @transform_0(%arg0: i32, %arg1: i32) -> (i32, i32) {
    %c0_i32 = arith.constant 0 : i32
    return %arg0, %arg1 : i32, i32
  }
  func.func @transform_1(%arg0: i32, %arg1: i32) -> (i32, i32) {
    %c0_i32 = arith.constant 0 : i32
    %c0_i32_0 = arith.constant 0 : i32
    return %arg0, %c0_i32 : i32, i32
  }
  func.func @transform_2(%arg0: i32, %arg1: i32) -> (i32, i32) {
    %c0_i32 = arith.constant 0 : i32
    %c0_i32_0 = arith.constant 0 : i32
    return %arg0, %c0_i32 : i32, i32
  }
}

</mosaic_0001>

<bundles_post_ra>
// kernel: tpu_custom_call.1
= control target key start
LH: loop header
LB: loop body
LE: loop exit
PB: predicated region body
PF: predicated region fallthrough
CT: control target
= control target key end

     0   :  { %8 = vsyncpa [#allocation3], 0  ;;  %s81_s9 = smov [#allocation2]   ;;  %s132_s0 = inlined_call_operand.hbm [shape: f32[8,256], index: 0, kind: input, shape index: {}]   ;;  %s133_s1 = inlined_call_operand.vmem [shape: f32[8,1], index: 1, kind: output, shape index: {0}]   ;;  %s134_s2 = inlined_call_operand.vmem [shape: f32[8,1], index: 2, kind: output, shape index: {1}]  }
   0x1   :  { %s15_s10 = sshll.u32 %s81_s9, 4  ;;  %s57_s13 = scalar_lea.hbm %s132_s0, 256  ;;  %s16_s10 = int_to_ptr.vmem [resolvable:$true] %s15_s10 }
   0x2   :  { %p58_p0 = scmp.ne.s32.totalorder %s132_s0, %s57_s13  ;;  %p61_p1 = scmp.lt.u32.totalorder %s57_s13, %s132_s0 }
   0x4   :  { %p63_p2 = pnand %p61_p1, %p58_p0 }
   0x6   :  { %66 = shalt.err (!%p63_p2)
}
   0x7   :  { %s67_s18 = scalar_lea.vmem %s16_s10, 256  ;;  %p72_p4 = scmp.lt.s32.totalorder %s16_s10, %s16_s10 }
   0x8   :  { %p68_p3 = scmp.ne.s32.totalorder %s16_s10, %s67_s18  ;;  %p73_p5 = scmp.lt.s32.totalorder %s67_s18, %s67_s18 }
   0xa   :  { %p74_p6 = por %p73_p5, %p72_p4 }
   0xc   :  { %p75_p7 = pnand %p74_p6, %p68_p3 }
   0xe   :  { %78 = shalt.err (!%p75_p7)
}
   0xf   :  { %18 = dma.hbm_to_vmem [thread:$0]  %s132_s0, 256, %s16_s10, [#allocation3]  }
  0x10   :  { %79 = dma.done.wait [#allocation3], 256  }
  0x11   :  { %80 = vsyncadd [#allocation3], 4294967040  ;;  %vm26_vm0 = vcmask 7168   ;;  %v82_v0 = vmov 0.0   ;;  %v29_v1 = vld [vmem:[#allocation2] sm:$0xff]  ;;  %v30_v2 = vld [vmem:[#allocation2 + $0x8] sm:$0xff] }
  0x12   :  { %27 = vst.msk [vmem:[%s133_s1] sm:$0xff] %vm26_vm0, %v82_v0  ;;  %28 = vst.msk [vmem:[%s134_s2] sm:$0xff] %vm26_vm0, %v82_v0  ;;  %v32_v3 = vadd.f32 %v30_v2, %v29_v1  ;;  %v39_v4 = vmul.f32 %v29_v1, %v29_v1  ;;  %v40_v5 = vmul.f32 %v30_v2, %v30_v2 }
  0x14   :  { %33 = vadd.xlane.f32.xlu0 %v32_v3  ;;  %v41_v6 = vadd.f32 %v40_v5, %v39_v4 }
  0x18   :  { %42 = vadd.xlane.f32.xlu0 %v41_v6 }
  0x19   :  { %v31_v7 = vld [vmem:[%s133_s1] sm:$0xff] }
  0x1a   :  { %v38_v10 = vld [vmem:[%s134_s2] sm:$0xff] }
  0xa1   :  { %v34_v8 = vpop.xlane.xlu0 %33 }
  0xa2   :  { %v35_v9 = vadd.f32 %v34_v8, %v31_v7 }
  0xa4   :  { %37 = vst.msk [vmem:[%s133_s1] sm:$0xff] %vm26_vm0, %v35_v9 }
  0xa5   :  { %v43_v11 = vpop.xlane.xlu0 %42 }
  0xa6   :  { %v44_v12 = vadd.f32 %v43_v11, %v38_v10 }
  0xa8   :  { %45 = vst.msk [vmem:[%s134_s2] sm:$0xff] %vm26_vm0, %v44_v12 }
  0xa9   :  { %54 = vsyncpa [#allocation3], 1 }

</bundles_post_ra>
